<compile_context>
chip_gen: v7x
topology: tpu7x:2x2x1
jax: 0.10.0
libtpu: 0.0.40
codegen_flags: <defaults>
</compile_context>

<pallas_src>
import numpy as np
import jax
import jax.numpy as jnp
from jax.experimental import pallas as pl
from jax.experimental.pallas import tpu as pltpu


def _round_up(a: int, b: int) -> int:
    return (a + b - 1) // b * b


# ------------------------------- kernel --------------------------------------
def linear_kernel(x_ref, w_ref, b_ref, o_ref, acc_ref):
    k = pl.program_id(2)

    @pl.when(k == 0)
    def _init():
        acc_ref[...] = jnp.zeros_like(acc_ref)

    acc_ref[...] += jnp.dot(x_ref[...], w_ref[...],
                            preferred_element_type=jnp.float32)

    @pl.when(k == pl.num_programs(2) - 1)
    def _finalize():
        o_ref[...] = (acc_ref[...] + b_ref[...]).astype(o_ref.dtype)


# ------------------------------ wrapper ---------------------------------------
def linear_forward(x, weight, bias=None, *, tm=256, tn=256, tk=512):
    """Matches torch.nn.Linear: out = x @ weight.T + bias.

    x:      (..., in_features)
    weight: (out_features, in_features)   (PyTorch layout)
    bias:   (out_features,) or None
    """
    orig_shape = x.shape
    in_f = int(orig_shape[-1])
    out_f = int(weight.shape[0])
    M = int(np.prod(orig_shape[:-1]))

    x2 = jnp.asarray(x, jnp.float32).reshape(M, in_f)
    w = jnp.asarray(weight, jnp.float32).T            # (in, out): lane-dense N
    if bias is None:
        bias = jnp.zeros((out_f,), jnp.float32)
    b = jnp.asarray(bias, jnp.float32).reshape(1, out_f)

    # ---- host-side padding to (8, 128)-aligned tiles (layout plumbing is
    # free outside the kernel; avoids masked partial loads/stores inside) ----
    Mp = _round_up(M, 8)
    Kp = _round_up(in_f, 128)
    Np = _round_up(out_f, 128)
    tm_ = min(tm, Mp)
    tk_ = min(tk, Kp)
    tn_ = min(tn, Np)
    Mp = _round_up(Mp, tm_)
    Kp = _round_up(Kp, tk_)
    Np = _round_up(Np, tn_)

    x2 = jnp.pad(x2, ((0, Mp - M), (0, Kp - in_f)))
    w = jnp.pad(w, ((0, Kp - in_f), (0, Np - out_f)))
    b = jnp.pad(b, ((0, 0), (0, Np - out_f)))

    grid = (Mp // tm_, Np // tn_, Kp // tk_)

    out = pl.pallas_call(
        linear_kernel,
        out_shape=jax.ShapeDtypeStruct((Mp, Np), jnp.float32),
        grid_spec=pltpu.PrefetchScalarGridSpec(
            num_scalar_prefetch=0,
            grid=grid,
            in_specs=[
                pl.BlockSpec((tm_, tk_), lambda i, j, k: (i, k)),   # activations
                pl.BlockSpec((tk_, tn_), lambda i, j, k: (k, j)),   # weight (pre-T)
                pl.BlockSpec((1, tn_), lambda i, j, k: (0, j)),     # bias
            ],
            out_specs=pl.BlockSpec((tm_, tn_), lambda i, j, k: (i, j)),
            scratch_shapes=[pltpu.VMEM((tm_, tn_), jnp.float32)],
        ),
        compiler_params=pltpu.CompilerParams(
            dimension_semantics=("parallel", "parallel", "arbitrary")),
    )(x2, w, b)

    return out[:M, :out_f].reshape(*orig_shape[:-1], out_f)


# --------------------------------- main ----------------------------------------
if __name__ == "__main__":
    key = jax.random.PRNGKey(0)
    k0, k1, k2, k3, k4, k5 = jax.random.split(key, 6)

    # shapes as the module is used in EFF_Net: x is (batch, H*W, channels)
    B, HW, in_f, out_f = 2, 256, 128, 256
    x = jax.random.normal(k0, (B, HW, in_f), jnp.float32)
    weight = 0.1 * jax.random.normal(k1, (out_f, in_f), jnp.float32)  # torch layout
    bias = 0.1 * jax.random.normal(k2, (out_f,), jnp.float32)

    out = jax.block_until_ready(linear_forward(x, weight, bias))
    assert out.shape == (B, HW, out_f)
    ref = jnp.dot(x, weight.T, precision=jax.lax.Precision.HIGHEST) + bias
    err = float(jnp.max(jnp.abs(out - ref)))
    assert err < 2e-3, f"main case: max abs error {err}"

    # small ragged / non-128-aligned case exercises the host-side padding path
    B2, S2, in2, out2 = 2, 10, 12, 24
    x_r = jax.random.normal(k3, (B2, S2, in2), jnp.float32)
    w_r = 0.1 * jax.random.normal(k4, (out2, in2), jnp.float32)
    b_r = 0.1 * jax.random.normal(k5, (out2,), jnp.float32)
    out_r = jax.block_until_ready(linear_forward(x_r, w_r, b_r))
    ref_r = jnp.dot(x_r, w_r.T, precision=jax.lax.Precision.HIGHEST) + b_r
    err_r = float(jnp.max(jnp.abs(out_r - ref_r)))
    assert err_r < 2e-3, f"ragged case: max abs error {err_r}"

    print("KERNEL_OK")
</pallas_src>

<mosaic_0001>
module attributes {stable_mosaic.version = 11 : i64} {
  func.func @linear_kernel(%arg0: i32, %arg1: i32, %arg2: i32, %arg3: memref<256x128xf32, #tpu.memory_space<vmem>>, %arg4: memref<128x256xf32, #tpu.memory_space<vmem>>, %arg5: memref<1x256xf32, #tpu.memory_space<vmem>>, %arg6: memref<256x256xf32, #tpu.memory_space<vmem>>, %arg7: memref<256x256xf32, #tpu.memory_space<vmem>>) attributes {dimension_semantics = [#tpu.dimension_semantics<parallel>, #tpu.dimension_semantics<parallel>, #tpu.dimension_semantics<arbitrary>], iteration_bounds = array<i64: 2, 1, 1>, scalar_prefetch = 0 : i64, scratch_operands = 1 : i64, tpu.core_type = #tpu.core_type<tc>, window_params = [{transform_indices = @transform_0, window_bounds = array<i64: 256, 128>}, {transform_indices = @transform_1, window_bounds = array<i64: 128, 256>}, {transform_indices = @transform_2, window_bounds = array<i64: 1, 256>}, {transform_indices = @transform_3, window_bounds = array<i64: 256, 256>}]} {
    %c0_i32 = arith.constant 0 : i32
    %0 = arith.cmpi eq, %arg2, %c0_i32 : i32
    %1 = arith.extui %0 : i1 to i32
    %c0_i32_0 = arith.constant 0 : i32
    %2 = arith.cmpi ne, %1, %c0_i32_0 : i32
    scf.if %2 {
      %cst_10 = arith.constant 0.000000e+00 : f32
      %12 = vector.broadcast %cst_10 : f32 to vector<256x256xf32>
      %c0_11 = arith.constant 0 : index
      %c0_12 = arith.constant 0 : index
      %13 = vector.load %arg7[%c0_11, %c0_12] : memref<256x256xf32, #tpu.memory_space<vmem>>, vector<256x256xf32>
      tpu.vector_store %arg7[%c0_11, %c0_12], %12 {strides = array<i32>} : memref<256x256xf32, #tpu.memory_space<vmem>>, vector<256x256xf32>,
    } else {
    }
    %c0 = arith.constant 0 : index
    %c0_1 = arith.constant 0 : index
    %3 = vector.load %arg7[%c0, %c0_1] : memref<256x256xf32, #tpu.memory_space<vmem>>, vector<256x256xf32>
    %c0_2 = arith.constant 0 : index
    %c0_3 = arith.constant 0 : index
    %4 = vector.load %arg3[%c0_2, %c0_3] : memref<256x128xf32, #tpu.memory_space<vmem>>, vector<256x128xf32>
    %c0_4 = arith.constant 0 : index
    %c0_5 = arith.constant 0 : index
    %5 = vector.load %arg4[%c0_4, %c0_5] : memref<128x256xf32, #tpu.memory_space<vmem>>, vector<128x256xf32>
    %cst = arith.constant dense<0.000000e+00> : vector<256x256xf32>
    %6 = tpu.matmul %4, %5, %cst {dimension_numbers = #tpu.dot_dimension_numbers<[1], [0], [0], [1], [0, 0, 1, 1], [], []>} : vector<256x128xf32>, vector<128x256xf32>, vector<256x256xf32> -> vector<256x256xf32>
    %7 = arith.addf %3, %6 : vector<256x256xf32>
    %c0_6 = arith.constant 0 : index
    %c0_7 = arith.constant 0 : index
    %8 = vector.load %arg7[%c0_6, %c0_7] : memref<256x256xf32, #tpu.memory_space<vmem>>, vector<256x256xf32>
    tpu.vector_store %arg7[%c0_6, %c0_7], %7 {strides = array<i32>} : memref<256x256xf32, #tpu.memory_space<vmem>>, vector<256x256xf32>,
    %c0_i32_8 = arith.constant 0 : i32
    %9 = arith.cmpi eq, %arg2, %c0_i32_8 : i32
    %10 = arith.extui %9 : i1 to i32
    %c0_i32_9 = arith.constant 0 : i32
    %11 = arith.cmpi ne, %10, %c0_i32_9 : i32
    scf.if %11 {
      %c0_10 = arith.constant 0 : index
      %c0_11 = arith.constant 0 : index
      %12 = vector.load %arg7[%c0_10, %c0_11] : memref<256x256xf32, #tpu.memory_space<vmem>>, vector<256x256xf32>
      %c0_12 = arith.constant 0 : index
      %c0_13 = arith.constant 0 : index
      %13 = vector.load %arg5[%c0_12, %c0_13] : memref<1x256xf32, #tpu.memory_space<vmem>>, vector<1x256xf32>
      %14 = vector.broadcast %13 : vector<1x256xf32> to vector<256x256xf32>
      %15 = arith.addf %12, %14 : vector<256x256xf32>
      %c0_14 = arith.constant 0 : index
      %c0_15 = arith.constant 0 : index
      %16 = vector.load %arg6[%c0_14, %c0_15] : memref<256x256xf32, #tpu.memory_space<vmem>>, vector<256x256xf32>
      tpu.vector_store %arg6[%c0_14, %c0_15], %15 {strides = array<i32>} : memref<256x256xf32, #tpu.memory_space<vmem>>, vector<256x256xf32>,
    } else {
    }
    return
  }
  func.func @transform_0(%arg0: i32, %arg1: i32, %arg2: i32) -> (i32, i32) {
    %c0_i32 = arith.constant 0 : i32
    return %arg0, %arg2 : i32, i32
  }
  func.func @transform_1(%arg0: i32, %arg1: i32, %arg2: i32) -> (i32, i32) {
    %c0_i32 = arith.constant 0 : i32
    return %arg2, %arg1 : i32, i32
  }
  func.func @transform_2(%arg0: i32, %arg1: i32, %arg2: i32) -> (i32, i32) {
    %c0_i32 = arith.constant 0 : i32
    %c0_i32_0 = arith.constant 0 : i32
    return %c0_i32, %arg1 : i32, i32
  }
  func.func @transform_3(%arg0: i32, %arg1: i32, %arg2: i32) -> (i32, i32) {
    %c0_i32 = arith.constant 0 : i32
    return %arg0, %arg1 : i32, i32
  }
}

</mosaic_0001>

<bundles_post_ra>
// kernel: tpu_custom_call.1
= control target key start
LH: loop header
LB: loop body
LE: loop exit
PB: predicated region body
PF: predicated region fallthrough
CT: control target
= control target key end

     0   :  { %8 = vsyncpa [#allocation4], 0  ;;  %s1936_s0 = inlined_call_operand.hbm [shape: f32[512,128], index: 0, kind: input, shape index: {}]   ;;  %s1937_s1 = inlined_call_operand.hbm [shape: f32[128,256], index: 1, kind: input, shape index: {}]   ;;  %s1938_s2 = inlined_call_operand.vmem [shape: f32[1,256], index: 2, kind: input, shape index: {}]   ;;  %s1939_s3 = inlined_call_operand.hbm [shape: f32[512,256], index: 3, kind: output, shape index: {}]  }
   0x1   :  { %10 = vsyncpa [#allocation4 + $0x1], 0 }
   0x2   :  { %11 = vsyncpa [#allocation7], 0 }
   0x3   :  { %12 = vsyncpa [#allocation5], 0 }
   0x4   :  { %14 = vsyncpa [#allocation5 + $0x1], 0  ;;  %s1512_s12 = smov 0   ;;  %s1514_s13 = smov 0  }
   0x5   :  { %s1516_s14 = smov 0   ;;  %s1518_s15 = smov 0  }
   0x6   :  { %s1520_s16 = smov 0   ;;  %s1522_s17 = smov 0  }
   0x7 LB: > { %s1186_s18 = sadd.s32 4294967295, %s1480_s17   ;;  %s1187_s19 = sadd.s32 4294967294, %s1480_s17   ;;  %s1480_s17 = sphi %s1522_s17, %s20_s17   ;;  %s1476_s16 = sphi %s1520_s16, %s1963_s16   ;;  %s1472_s15 = sphi %s1518_s15, %s1962_s15   ;;  %s1468_s14 = sphi %s1516_s14, %s1961_s14   ;;  %s1464_s13 = sphi %s1514_s13, %s1960_s13   ;;  %s1460_s12 = sphi %s1512_s12, %s1959_s12  }
   0x8   : > { %p61_p0 = scmp.ne.s32.totalorder %s1464_s13, %s1460_s12  ;;  %p1546_p1 = scmp.eq.s32.totalorder %s1186_s18, 0 }
   0x9   : > { %p1550_p2 = scmp.eq.s32.totalorder %s1186_s18, 1  ;;  %p147_p3 = scmp.eq.s32.totalorder %s1187_s19, 1 }
   0xa   : > { %s1944_s20 = scalar_select %p1546_p1, 1, 0 }
   0xb   : > { %s1945_s21 = scalar_select %p1550_p2, 1, 0 }
   0xc   : > { %p1556_p4 = por %p1546_p1, %p61_p0  ;;  %p1188_p5 = scmp.ge.s32.totalorder %s1480_s17, 1 }
   0xd   : > { %p1561_p6 = por %p147_p3, %p61_p0  ;;  %p154_p7 = scmp.lt.s32.totalorder %s1480_s17, 3 }
   0xe   : > { %s1946_s22 = scalar_select %p1556_p4, 1, 0 }
   0xf   : > { %s1947_s23 = scalar_select %p1561_p6, 1, 0 }
  0x10   : > { %p1566_p8 = pnand %p1188_p5, %p154_p7  ;;  %s1482_s25 = smov [#allocation6]  }
  0x11   : > { %s172_s26 = sshll.u32 %s1482_s25, 4  ;;  %s39_s28 = sadd.s32 1, %s1476_s16  ;;  %s173_s26 = int_to_ptr.vmem [resolvable:$true] %s172_s26 }
  0x12   : > { %s1948_s24 = scalar_select %p1566_p8, 1, 0 }
  0x13   : > { %p1264_p9 = pneg %p1566_p8  ;;  %s1336_s4 = scalar_lea.hbm %s1937_s1, 4096 }
  0x14   : > { %p1337_p12 = scmp.ne.s32.totalorder %s1937_s1, %s1336_s4  ;;  %p1343_p5 = scmp.lt.u32.totalorder %s1336_s4, %s1937_s1 }
  0x15   : > { %p1575_p11 = pnand %p1264_p9, %p1546_p1 }
  0x17   : > { %p1338_p13 = pneg %p1575_p11 }
  0x19   : > { %p1339_p0 = pnand %p1338_p13, %p1337_p12 }
  0x1b   : > { %p1340_p3 = pneg %p1339_p0 }
  0x1d   : > { %p1345_p7 = pnand %p1343_p5, %p1340_p3 }
  0x1f   : > { %1348 = shalt.err (!%p1345_p7)
}
  0x20   : > { %s1349_s9 = scalar_lea.vmem %s173_s26, 4096  ;;  %p1357_p1 = scmp.lt.s32.totalorder %s173_s26, %s173_s26 }
  0x21   : > { %p1350_p9 = scmp.ne.s32.totalorder %s173_s26, %s1349_s9  ;;  %p1358_p4 = scmp.lt.s32.totalorder %s1349_s9, %s1349_s9 }
  0x23   : > { %p1352_p10 = pnand %p1350_p9, %p1338_p13  ;;  %p1359_p8 = por %p1358_p4, %p1357_p1 }
  0x25   : > { %p1353_p6 = pneg %p1352_p10 }
  0x27   : > { %p1360_p2 = pnand %p1359_p8, %p1353_p6 }
  0x29   : > { %1363 = shalt.err (!%p1360_p2)
}
  0x2a   : > { %s1483_s10 = smov 256   ;;  %s1484_s11 = smov 16  }
  0x2b   : > { %1267 = dma.hbm_to_vmem [thread:$0]  (!%p1575_p11), %s1937_s1, 4096, %s173_s26, [#allocation7], %s1483_s10, %s1483_s10, %s1484_s11  }
  0x2c   : > { %p41_p1 = scmp.ge.s32.totalorder %s39_s28, 2  ;;  %s48_s25 = sadd.s32 1, %s1468_s14 }
  0x2d   : > { %p55_p2 = scmp.ne.s32.totalorder %s1468_s14, %s1464_s13  ;;  %p56_p4 = scmp.eq.s32.totalorder %s1480_s17, 0 }
  0x2e   : > { %s1965_s28 = smov (%p41_p1, %s39_s28), 0  ;;  %p1951_p8 = scmp.ne.s32.totalorder %s1945_s21, 0 }
  0x2f   : > { %p1602_p6 = por %p56_p4, %p55_p2  ;;  %s43_s27 = ssub.s32 %s1476_s16, %s1965_s28 }
  0x30   : > { %p1608_p10 = por %p1951_p8, %p55_p2  ;;  %p1277_p12 = scmp.lt.s32.totalorder %s1480_s17, 2 }
  0x31   : > { %p46_p11 = scmp.eq.s32.totalorder %s43_s27, 0  ;;  %s194_s26 = sand.u32 1, %s1468_s14  }
  0x32   : > { %s1192_s4 = sshll.u32 %s194_s26, 8  ;;  %s1205_s6 = sshll.u32 %s1476_s16, 12 }
  0x33   : > { %s1617_s5 = scalar_select %p46_p11, %s1468_s14, %s48_s25  }
  0x34   : > { %s1623_s9 = scalar_lea.hbm %s1936_s0, %s1205_s6  ;;  %s198_s21 = scalar_lea.vmem [#allocation3], %s1192_s4 }
  0x35   : > { %s206_s10 = sshll.u32 %s198_s21, 4  ;;  %p1629_p13 = pnand %p1277_p12, %p1602_p6  ;;  %s1625_s10 = int_to_ptr.vmem [resolvable:$true] %s206_s10 }
  0x36   : > { %s1633_s18 = scalar_lea.sflag [#allocation4], %s194_s26  ;;  %s1364_s19 = scalar_lea.hbm %s1623_s9, 4096 }
  0x37   : > { %p1365_p0 = scmp.ne.s32.totalorder %s1623_s9, %s1364_s19  ;;  %p1366_p3 = pneg %p1629_p13 }
  0x38   : > { %s1369_s29 = scalar_lea.hbm %s1936_s0, 8192  ;;  %p1370_p9 = scmp.lt.u32.totalorder %s1623_s9, %s1936_s0 }
  0x39   : > { %p1367_p5 = pnand %p1366_p3, %p1365_p0  ;;  %p1371_p1 = scmp.lt.u32.totalorder %s1369_s29, %s1364_s19 }
  0x3a   : > { %p1373_p4 = scmp.lt.u32.totalorder %s1364_s19, %s1623_s9 }
  0x3b   : > { %p1368_p7 = pneg %p1367_p5  ;;  %p1372_p2 = por %p1371_p1, %p1370_p9 }
  0x3d   : > { %p1374_p6 = por %p1373_p4, %p1372_p2 }
  0x3f   : > { %p1375_p8 = pnand %p1374_p6, %p1368_p7 }
  0x41   : > { %1378 = shalt.err (!%p1375_p8)
}
  0x42   : > { %s1379_s26 = scalar_lea.vmem %s1625_s10, 4096  ;;  %s1485_s7 = smov [#allocation3]  }
  0x43   : > { %p1380_p12 = scmp.ne.s32.totalorder %s1625_s10, %s1379_s26  ;;  %s1384_s8 = sshll.u32 %s1485_s7, 4  ;;  %s1385_s8 = int_to_ptr.vmem [resolvable:$false] %s1384_s8 }
  0x44   : > { %s1386_s21 = scalar_lea.vmem %s1385_s8, 8192  ;;  %p1387_p5 = scmp.lt.s32.totalorder %s1625_s10, %s1385_s8 }
  0x45   : > { %p1382_p11 = pnand %p1380_p12, %p1366_p3  ;;  %p1388_p9 = scmp.lt.s32.totalorder %s1386_s21, %s1379_s26 }
  0x47   : > { %p1383_p0 = pneg %p1382_p11  ;;  %p1389_p1 = por %p1388_p9, %p1387_p5 }
  0x49   : > { %p1390_p2 = pnand %p1389_p1, %p1383_p0 }
  0x4b   : > { %1393 = shalt.err (!%p1390_p2)
}
  0x4c   : > { %s1486_s19 = smov 128   ;;  %s1487_s25 = smov 8  }
  0x4d   : > { %1271 = dma.hbm_to_vmem [thread:$0]  (!%p1629_p13), %s1623_s9, 4096, %s1625_s10, %s1633_s18, %s1486_s19, %s1486_s19, %s1487_s25  }
  0x4e   : > { %p1954_p3 = scmp.ne.s32.totalorder %s1948_s24, 0 }
  0x4f   : > { %s1664_s27 = sand.u32 (!%p1954_p3), 1, %s1464_s13   ;;  %p1955_p7 = scmp.ne.s32.totalorder (!%p1954_p3), %s1946_s22, 0 }
  0x50   : > { %218 = sbr.rel (%p1954_p3) target bundleno = 416 (0x1a0), region = 32  ;;  %s1196_s29 = sshll.u32 (!%p1954_p3), %s1664_s27, 8 }
  0x51   : > { %s221_s4 = scalar_lea.sflag (!%p1954_p3), [#allocation4], %s1664_s27  ;;  %s1668_s6 = scalar_lea.vmem (!%p1954_p3), [#allocation3], %s1196_s29 }
  0x57   : > { %1447 = dma.done.wait (%p1955_p7), %s221_s4, 4096  }
  0x58   : > { %1449 = vsyncadd (%p1955_p7), %s221_s4, 4294963200  ;;  %p1956_p13 = scmp.ne.s32.totalorder %s1944_s20, 0 }
  0x5a   : > { %1451 = dma.done.wait (%p1956_p13), [#allocation7], 4096  }
  0x5b   : > { %1453 = vsyncadd (%p1956_p13), [#allocation7], 4294963200  ;;  %v1488_v0 = vmov 0.0   ;;  %v430_v1 = vld [vmem:[#allocation6 + $0x8] sm:$0xff]  ;;  %v432_v2 = vld [vmem:[#allocation6 + $0x18] sm:$0xff]  ;;  %s1198_s24 = sshll.u32 %s1664_s27, 9 }
  0x5c   : > { %525 = vmatprep.mubr.f32.mxu0 %v1488_v0  ;;  %621 = vmatprep.mubr.f32.mxu1 %v1488_v0  ;;  %v429_v3 = vld [vmem:[#allocation6] sm:$0xff]  ;;  %v1208_v4 = vpack.c.bf16 %v432_v2, %v430_v1  ;;  %v431_v5 = vld [vmem:[#allocation6 + $0x10] sm:$0xff]  ;;  %v434_v6 = vld [vmem:[#allocation6 + $0x28] sm:$0xff]  ;;  %s1754_s9 = scalar_lea.vmem [#allocation8], %s1198_s24  ;;  %s1207_s10 = sshll.u32 %s1472_s15, 13 }
  0x5d   : > { %v436_v7 = vld [vmem:[#allocation6 + $0x38] sm:$0xff]  ;;  %v1210_v8 = vpack.c.bf16 %v431_v5, %v429_v3  ;;  %v433_v10 = vld [vmem:[#allocation6 + $0x20] sm:$0xff]  ;;  %v435_v11 = vld [vmem:[#allocation6 + $0x30] sm:$0xff]  ;;  %s1070_s11 = sshll.u32 %s1754_s9, 4  ;;  %s1879_s26 = scalar_lea.hbm %s1939_s3, %s1207_s10  ;;  %s1881_s11 = int_to_ptr.vmem [resolvable:$true] %s1070_s11 }
  0x5e   : > { %v1212_v9 = vpack.c.bf16 %v436_v7, %v434_v6  ;;  %v438_v12 = vld [vmem:[#allocation6 + $0x48] sm:$0xff]  ;;  %1209 = vmatprep.subr.bf16.mxu0 %v1208_v4  ;;  %1240 = vmatprep.subr.bf16.mxu1 %v1208_v4  ;;  %v440_v13 = vld [vmem:[#allocation6 + $0x58] sm:$0xff]  ;;  %v1214_v14 = vpack.c.bf16 %v435_v11, %v433_v10  ;;  %v437_v16 = vld [vmem:[#allocation6 + $0x40] sm:$0xff]  ;;  %s1054_s7 = scalar_lea.sflag [#allocation5], %s1664_s27  ;;  %s1394_s8 = scalar_lea.vmem %s1881_s11, 8192 }
  0x5f   : > { %1211 = vmatpush1.bf16.msra.mxu0 %v1210_v8  ;;  %1248 = vmatpush1.bf16.msra.mxu1 %v1210_v8  ;;  %v1216_v15 = vpack.c.bf16 %v440_v13, %v438_v12  ;;  %v439_v17 = vld [vmem:[#allocation6 + $0x50] sm:$0xff]  ;;  %v442_v18 = vld [vmem:[#allocation6 + $0x68] sm:$0xff]  ;;  %v444_v19 = vld [vmem:[#allocation6 + $0x78] sm:$0xff]  ;;  %p1395_p4 = scmp.ne.s32.totalorder %s1881_s11, %s1394_s8  ;;  %s1489_s21 = smov [#allocation8]  }
  0x60   : > { %1213 = vmatprep.subr.bf16.mxu0 %v1212_v9  ;;  %1241 = vmatprep.subr.bf16.mxu1 %v1212_v9  ;;  %v1218_v20 = vpack.c.bf16 %v439_v17, %v437_v16  ;;  %v1220_v21 = vpack.c.bf16 %v444_v19, %v442_v18  ;;  %v441_v22 = vld [vmem:[#allocation6 + $0x60] sm:$0xff]  ;;  %v443_v23 = vld [vmem:[#allocation6 + $0x70] sm:$0xff]  ;;  %v446_v24 = vld [vmem:[#allocation6 + $0x88] sm:$0xff]  ;;  %v915_v18 = vlaneseq  ;;  %s1398_s19 = sshll.u32 %s1489_s21, 4  ;;  %s1399_s19 = int_to_ptr.vmem [resolvable:$false] %s1398_s19 }
  0x61   : > { %v448_v25 = vld [vmem:[#allocation6 + $0x98] sm:$0xff]  ;;  %v1222_v26 = vpack.c.bf16 %v443_v23, %v441_v22  ;;  %v445_v28 = vld [vmem:[#allocation6 + $0x80] sm:$0xff]  ;;  %v447_v29 = vld [vmem:[#allocation6 + $0x90] sm:$0xff]  ;;  %p1396_p6 = pnand %p1395_p4, %p1608_p10  ;;  %s1400_s25 = scalar_lea.vmem %s1399_s19, 16384 }
  0x62   : > { %v1224_v27 = vpack.c.bf16 %v448_v25, %v446_v24  ;;  %v450_v30 = vld [vmem:[#allocation6 + $0xa8] sm:$0xff]  ;;  %v452_v31 = vld [vmem:[#allocation6 + $0xb8] sm:$0xff]  ;;  %v1226_v32 = vpack.c.bf16 %v447_v29, %v445_v28  ;;  %v449_v34 = vld [vmem:[#allocation6 + $0xa0] sm:$0xff]  ;;  %v916_v19 = vshrl.u32 %v915_v18, 7  ;;  %p1401_p12 = scmp.lt.s32.totalorder %s1881_s11, %s1399_s19  ;;  %p1402_p11 = scmp.lt.s32.totalorder %s1400_s25, %s1394_s8 }
  0x63   : > { %1215 = vmatpush1.bf16.msra.mxu0 %v1214_v14  ;;  %1249 = vmatpush1.bf16.msra.mxu1 %v1214_v14  ;;  %v1228_v33 = vpack.c.bf16 %v452_v31, %v450_v30  ;;  %v451_v35 = vld [vmem:[#allocation6 + $0xb0] sm:$0xff]  ;;  %v454_v36 = vld [vmem:[#allocation6 + $0xc8] sm:$0xff]  ;;  %v456_v37 = vld [vmem:[#allocation6 + $0xd8] sm:$0xff]  ;;  %p1397_p8 = pneg %p1396_p6 }
  0x64   : > { %1217 = vmatprep.subr.bf16.mxu0 %v1216_v15  ;;  %1242 = vmatprep.subr.bf16.mxu1 %v1216_v15  ;;  %v1230_v38 = vpack.c.bf16 %v451_v35, %v449_v34  ;;  %v1232_v39 = vpack.c.bf16 %v456_v37, %v454_v36  ;;  %v453_v40 = vld [vmem:[#allocation6 + $0xc0] sm:$0xff]  ;;  %v455_v41 = vld [vmem:[#allocation6 + $0xd0] sm:$0xff]  ;;  %v458_v42 = vld [vmem:[#allocation6 + $0xe8] sm:$0xff]  ;;  %v921_v22 = vsub.s32 1, %v916_v19  ;;  %p1403_p0 = por %p1402_p11, %p1401_p12 }
  0x65   : > { %v460_v43 = vld [vmem:[#allocation6 + $0xf8] sm:$0xff]  ;;  %v1234_v44 = vpack.c.bf16 %v455_v41, %v453_v40  ;;  %v457_v46 = vld [vmem:[#allocation6 + $0xe0] sm:$0xff]  ;;  %v459_v47 = vld [vmem:[#allocation6 + $0xf0] sm:$0xff] }
  0x66   : > { %v1236_v45 = vpack.c.bf16 %v460_v43, %v458_v42  ;;  %v1238_v48 = vpack.c.bf16 %v459_v47, %v457_v46  ;;  %v397_v49 = vld [vmem:[%s1668_s6] sm:$0xff]  ;;  %v398_v51 = vld [vmem:[%s1668_s6 + $0x8] sm:$0xff]  ;;  %v399_v53 = vld [vmem:[%s1668_s6 + $0x10] sm:$0xff]  ;;  %p1404_p5 = pnand %p1403_p0, %p1397_p8 }
  0x67   : > { %1219 = vmatpush1.bf16.msra.mxu0 %v1218_v20  ;;  %1250 = vmatpush1.bf16.msra.mxu1 %v1218_v20  ;;  %v413_v50 = vld [vmem:[%s1668_s6 + $0x80] sm:$0xff]  ;;  %v414_v52 = vld [vmem:[%s1668_s6 + $0x88] sm:$0xff]  ;;  %v415_v54 = vld [vmem:[%s1668_s6 + $0x90] sm:$0xff]  ;;  %v917_v20 = vsub.s32 0, %v916_v19 }
  0x68   : > { %1221 = vmatprep.subr.bf16.mxu0 %v1220_v21  ;;  %1243 = vmatprep.subr.bf16.mxu1 %v1220_v21  ;;  %v400_v55 = vld [vmem:[%s1668_s6 + $0x18] sm:$0xff]  ;;  %v401_v57 = vld [vmem:[%s1668_s6 + $0x20] sm:$0xff]  ;;  %v402_v59 = vld [vmem:[%s1668_s6 + $0x28] sm:$0xff] }
  0x69   : > { %v416_v56 = vld [vmem:[%s1668_s6 + $0x98] sm:$0xff]  ;;  %v417_v58 = vld [vmem:[%s1668_s6 + $0xa0] sm:$0xff]  ;;  %v418_v60 = vld [vmem:[%s1668_s6 + $0xa8] sm:$0xff] }
  0x6a   : > { %v403_v61 = vld [vmem:[%s1668_s6 + $0x30] sm:$0xff]  ;;  %v404_v63 = vld [vmem:[%s1668_s6 + $0x38] sm:$0xff]  ;;  %v405_v2 = vld [vmem:[%s1668_s6 + $0x40] sm:$0xff] }
  0x6b   : > { %1223 = vmatpush1.bf16.msra.mxu0 %v1222_v26  ;;  %1251 = vmatpush1.bf16.msra.mxu1 %v1222_v26  ;;  %v419_v62 = vld [vmem:[%s1668_s6 + $0xb0] sm:$0xff]  ;;  %v420_v1 = vld [vmem:[%s1668_s6 + $0xb8] sm:$0xff]  ;;  %v421_v3 = vld [vmem:[%s1668_s6 + $0xc0] sm:$0xff] }
  0x6c   : > { %1225 = vmatprep.subr.bf16.mxu0 %v1224_v27  ;;  %1244 = vmatprep.subr.bf16.mxu1 %v1224_v27  ;;  %v406_v4 = vld [vmem:[%s1668_s6 + $0x48] sm:$0xff]  ;;  %v407_v6 = vld [vmem:[%s1668_s6 + $0x50] sm:$0xff]  ;;  %v408_v8 = vld [vmem:[%s1668_s6 + $0x58] sm:$0xff] }
  0x6d   : > { %v422_v5 = vld [vmem:[%s1668_s6 + $0xc8] sm:$0xff]  ;;  %v423_v7 = vld [vmem:[%s1668_s6 + $0xd0] sm:$0xff]  ;;  %v424_v9 = vld [vmem:[%s1668_s6 + $0xd8] sm:$0xff] }
  0x6e   : > { %v409_v10 = vld [vmem:[%s1668_s6 + $0x60] sm:$0xff]  ;;  %v410_v12 = vld [vmem:[%s1668_s6 + $0x68] sm:$0xff]  ;;  %v411_v14 = vld [vmem:[%s1668_s6 + $0x70] sm:$0xff] }
  0x6f   : > { %1227 = vmatpush1.bf16.msra.mxu0 %v1226_v32  ;;  %1252 = vmatpush1.bf16.msra.mxu1 %v1226_v32  ;;  %v425_v11 = vld [vmem:[%s1668_s6 + $0xe0] sm:$0xff]  ;;  %v426_v13 = vld [vmem:[%s1668_s6 + $0xe8] sm:$0xff]  ;;  %v427_v15 = vld [vmem:[%s1668_s6 + $0xf0] sm:$0xff] }
  0x70   : > { %1229 = vmatprep.subr.bf16.mxu0 %v1228_v33  ;;  %1245 = vmatprep.subr.bf16.mxu1 %v1228_v33  ;;  %v412_v16 = vld [vmem:[%s1668_s6 + $0x78] sm:$0xff]  ;;  %v913_v21 = vld [vmem:[%s1938_s2] sm:$0x3] }
  0x71   : > { %v428_v17 = vld [vmem:[%s1668_s6 + $0xf8] sm:$0xff]  ;;  %v1746_v23 = vrot.slane %v913_v21, %v917_v20  ;;  %v1748_v24 = vrot.slane %v913_v21, %v921_v22 }
  0x73   : > { %1231 = vmatpush1.bf16.msra.mxu0 %v1230_v38  ;;  %1253 = vmatpush1.bf16.msra.mxu1 %v1230_v38 }
  0x74   : > { %1233 = vmatprep.subr.bf16.mxu0 %v1232_v39  ;;  %1246 = vmatprep.subr.bf16.mxu1 %v1232_v39 }
  0x77   : > { %1235 = vmatpush1.bf16.msra.mxu0 %v1234_v44  ;;  %1254 = vmatpush1.bf16.msra.mxu1 %v1234_v44 }
  0x78   : > { %1237 = vmatprep.subr.bf16.mxu0 %v1236_v45  ;;  %1247 = vmatprep.subr.bf16.mxu1 %v1236_v45 }
  0x7b   : > { %1239 = vmatpush1.bf16.msra.mxu0 %v1238_v48  ;;  %1255 = vmatpush1.bf16.msra.mxu1 %v1238_v48 }
  0x7e   : > { %526 = vmatmul.mubr.f32.vlgmr.msra.gmra.mrb[0].mxu0 %v397_v49  ;;  %622 = vmatmul.mubr.f32.vlgmr.msra.gmra.mrb[0].mxu1 %v413_v50 }
  0x7f   : > { %531 = vmatprep.mubr.f32.mxu0 %v1488_v0  ;;  %627 = vmatprep.mubr.f32.mxu1 %v1488_v0 }
  0x82   : > { %532 = vmatmul.mubr.f32.gmra.mrb[2].mxu0 %v398_v51  ;;  %628 = vmatmul.mubr.f32.gmra.mrb[2].mxu1 %v414_v52 }
  0x83   : > { %537 = vmatprep.mubr.f32.mxu0 %v1488_v0  ;;  %633 = vmatprep.mubr.f32.mxu1 %v1488_v0 }
  0x86   : > { %538 = vmatmul.mubr.f32.gmra.mrb[4].mxu0 %v399_v53  ;;  %634 = vmatmul.mubr.f32.gmra.mrb[4].mxu1 %v415_v54 }
  0x87   : > { %543 = vmatprep.mubr.f32.mxu0 %v1488_v0  ;;  %639 = vmatprep.mubr.f32.mxu1 %v1488_v0 }
  0x8a   : > { %544 = vmatmul.mubr.f32.gmra.mrb[6].mxu0 %v400_v55  ;;  %640 = vmatmul.mubr.f32.gmra.mrb[6].mxu1 %v416_v56 }
  0x8b   : > { %549 = vmatprep.mubr.f32.mxu0 %v1488_v0  ;;  %645 = vmatprep.mubr.f32.mxu1 %v1488_v0 }
  0x8e   : > { %550 = vmatmul.mubr.f32.gmra.mrb[8].mxu0 %v401_v57  ;;  %646 = vmatmul.mubr.f32.gmra.mrb[8].mxu1 %v417_v58 }
  0x8f   : > { %555 = vmatprep.mubr.f32.mxu0 %v1488_v0  ;;  %651 = vmatprep.mubr.f32.mxu1 %v1488_v0 }
  0x92   : > { %556 = vmatmul.mubr.f32.gmra.mrb[10].mxu0 %v402_v59  ;;  %652 = vmatmul.mubr.f32.gmra.mrb[10].mxu1 %v418_v60 }
  0x93   : > { %561 = vmatprep.mubr.f32.mxu0 %v1488_v0  ;;  %657 = vmatprep.mubr.f32.mxu1 %v1488_v0 }
  0x96   : > { %562 = vmatmul.mubr.f32.gmra.mrb[12].mxu0 %v403_v61  ;;  %658 = vmatmul.mubr.f32.gmra.mrb[12].mxu1 %v419_v62 }
  0x97   : > { %567 = vmatprep.mubr.f32.mxu0 %v1488_v0  ;;  %663 = vmatprep.mubr.f32.mxu1 %v1488_v0 }
  0x9a   : > { %568 = vmatmul.mubr.f32.gmra.mrb[14].mxu0 %v404_v63  ;;  %664 = vmatmul.mubr.f32.gmra.mrb[14].mxu1 %v420_v1 }
  0x9b   : > { %573 = vmatprep.mubr.f32.mxu0 %v1488_v0  ;;  %669 = vmatprep.mubr.f32.mxu1 %v1488_v0 }
  0x9e   : > { %574 = vmatmul.mubr.f32.gmra.mrb[16].mxu0 %v405_v2  ;;  %670 = vmatmul.mubr.f32.gmra.mrb[16].mxu1 %v421_v3 }
  0x9f   : > { %579 = vmatprep.mubr.f32.mxu0 %v1488_v0  ;;  %675 = vmatprep.mubr.f32.mxu1 %v1488_v0 }
  0xa2   : > { %580 = vmatmul.mubr.f32.gmra.mrb[18].mxu0 %v406_v4  ;;  %676 = vmatmul.mubr.f32.gmra.mrb[18].mxu1 %v422_v5 }
  0xa3   : > { %585 = vmatprep.mubr.f32.mxu0 %v1488_v0  ;;  %681 = vmatprep.mubr.f32.mxu1 %v1488_v0 }
  0xa6   : > { %586 = vmatmul.mubr.f32.gmra.mrb[20].mxu0 %v407_v6  ;;  %682 = vmatmul.mubr.f32.gmra.mrb[20].mxu1 %v423_v7 }
  0xa7   : > { %591 = vmatprep.mubr.f32.mxu0 %v1488_v0  ;;  %687 = vmatprep.mubr.f32.mxu1 %v1488_v0 }
  0xaa   : > { %592 = vmatmul.mubr.f32.gmra.mrb[22].mxu0 %v408_v8  ;;  %688 = vmatmul.mubr.f32.gmra.mrb[22].mxu1 %v424_v9 }
  0xab   : > { %597 = vmatprep.mubr.f32.mxu0 %v1488_v0  ;;  %693 = vmatprep.mubr.f32.mxu1 %v1488_v0 }
  0xae   : > { %598 = vmatmul.mubr.f32.gmra.mrb[24].mxu0 %v409_v10  ;;  %694 = vmatmul.mubr.f32.gmra.mrb[24].mxu1 %v425_v11 }
  0xaf   : > { %603 = vmatprep.mubr.f32.mxu0 %v1488_v0  ;;  %699 = vmatprep.mubr.f32.mxu1 %v1488_v0 }
  0xb2   : > { %604 = vmatmul.mubr.f32.gmra.mrb[26].mxu0 %v410_v12  ;;  %700 = vmatmul.mubr.f32.gmra.mrb[26].mxu1 %v426_v13 }
  0xb3   : > { %609 = vmatprep.mubr.f32.mxu0 %v1488_v0  ;;  %705 = vmatprep.mubr.f32.mxu1 %v1488_v0 }
  0xb6   : > { %610 = vmatmul.mubr.f32.gmra.mrb[28].mxu0 %v411_v14  ;;  %706 = vmatmul.mubr.f32.gmra.mrb[28].mxu1 %v427_v15 }
  0xb7   : > { %615 = vmatprep.mubr.f32.mxu0 %v1488_v0  ;;  %711 = vmatprep.mubr.f32.mxu1 %v1488_v0 }
  0xba   : > { %616 = vmatmul.mubr.f32.gmra.mrb[30].mxu0 %v412_v16  ;;  %712 = vmatmul.mubr.f32.gmra.mrb[30].mxu1 %v428_v17 }
 0x151   : > { %v527_v25 = vpop.f32.mrb[0].mxu0  ;;  %v623_v26 = vpop.f32.mrb[0].mxu1 }
 0x152   : > { %v925_v0 = vadd.f32 %v1746_v23, %v527_v25  ;;  %v957_v27 = vadd.f32 %v1746_v23, %v623_v26  ;;  %v529_v28 = vpop.f32.mrb[1].mxu0  ;;  %v625_v29 = vpop.f32.mrb[1].mxu1 }
 0x153   : > { %v926_v30 = vadd.f32 %v1748_v24, %v529_v28  ;;  %v958_v31 = vadd.f32 %v1748_v24, %v625_v29 }
 0x154   : > { %989 = vst [vmem:[%s1754_s9] sm:$0xff] %v925_v0  ;;  %1021 = vst [vmem:[%s1754_s9 + $0x100] sm:$0xff] %v957_v27 }
 0x155   : > { %990 = vst [vmem:[%s1754_s9 + $0x8] sm:$0xff] %v926_v30  ;;  %1022 = vst [vmem:[%s1754_s9 + $0x108] sm:$0xff] %v958_v31  ;;  %v533_v32 = vpop.f32.mrb[2].mxu0  ;;  %v629_v33 = vpop.f32.mrb[2].mxu1 }
 0x156   : > { %v927_v34 = vadd.f32 %v1746_v23, %v533_v32  ;;  %v959_v35 = vadd.f32 %v1746_v23, %v629_v33  ;;  %v535_v36 = vpop.f32.mrb[3].mxu0  ;;  %v631_v37 = vpop.f32.mrb[3].mxu1 }
 0x157   : > { %v928_v38 = vadd.f32 %v1748_v24, %v535_v36  ;;  %v960_v39 = vadd.f32 %v1748_v24, %v631_v37 }
 0x158   : > { %991 = vst [vmem:[%s1754_s9 + $0x10] sm:$0xff] %v927_v34  ;;  %1023 = vst [vmem:[%s1754_s9 + $0x110] sm:$0xff] %v959_v35 }
 0x159   : > { %992 = vst [vmem:[%s1754_s9 + $0x18] sm:$0xff] %v928_v38  ;;  %1024 = vst [vmem:[%s1754_s9 + $0x118] sm:$0xff] %v960_v39  ;;  %v539_v40 = vpop.f32.mrb[4].mxu0  ;;  %v635_v41 = vpop.f32.mrb[4].mxu1 }
 0x15a   : > { %v929_v42 = vadd.f32 %v1746_v23, %v539_v40  ;;  %v961_v43 = vadd.f32 %v1746_v23, %v635_v41  ;;  %v541_v44 = vpop.f32.mrb[5].mxu0  ;;  %v637_v45 = vpop.f32.mrb[5].mxu1 }
 0x15b   : > { %v930_v46 = vadd.f32 %v1748_v24, %v541_v44  ;;  %v962_v47 = vadd.f32 %v1748_v24, %v637_v45 }
 0x15c   : > { %993 = vst [vmem:[%s1754_s9 + $0x20] sm:$0xff] %v929_v42  ;;  %1025 = vst [vmem:[%s1754_s9 + $0x120] sm:$0xff] %v961_v43 }
 0x15d   : > { %994 = vst [vmem:[%s1754_s9 + $0x28] sm:$0xff] %v930_v46  ;;  %1026 = vst [vmem:[%s1754_s9 + $0x128] sm:$0xff] %v962_v47  ;;  %v545_v48 = vpop.f32.mrb[6].mxu0  ;;  %v641_v49 = vpop.f32.mrb[6].mxu1 }
 0x15e   : > { %v931_v50 = vadd.f32 %v1746_v23, %v545_v48  ;;  %v963_v51 = vadd.f32 %v1746_v23, %v641_v49  ;;  %v547_v52 = vpop.f32.mrb[7].mxu0  ;;  %v643_v53 = vpop.f32.mrb[7].mxu1 }
 0x15f   : > { %v932_v54 = vadd.f32 %v1748_v24, %v547_v52  ;;  %v964_v55 = vadd.f32 %v1748_v24, %v643_v53 }
 0x160   : > { %995 = vst [vmem:[%s1754_s9 + $0x30] sm:$0xff] %v931_v50  ;;  %1027 = vst [vmem:[%s1754_s9 + $0x130] sm:$0xff] %v963_v51 }
 0x161   : > { %996 = vst [vmem:[%s1754_s9 + $0x38] sm:$0xff] %v932_v54  ;;  %1028 = vst [vmem:[%s1754_s9 + $0x138] sm:$0xff] %v964_v55  ;;  %v551_v56 = vpop.f32.mrb[8].mxu0  ;;  %v647_v57 = vpop.f32.mrb[8].mxu1 }
 0x162   : > { %v933_v58 = vadd.f32 %v1746_v23, %v551_v56  ;;  %v965_v59 = vadd.f32 %v1746_v23, %v647_v57  ;;  %v553_v60 = vpop.f32.mrb[9].mxu0  ;;  %v649_v61 = vpop.f32.mrb[9].mxu1 }
 0x163   : > { %v934_v62 = vadd.f32 %v1748_v24, %v553_v60  ;;  %v966_v63 = vadd.f32 %v1748_v24, %v649_v61 }
 0x164   : > { %997 = vst [vmem:[%s1754_s9 + $0x40] sm:$0xff] %v933_v58  ;;  %1029 = vst [vmem:[%s1754_s9 + $0x140] sm:$0xff] %v965_v59 }
 0x165   : > { %998 = vst [vmem:[%s1754_s9 + $0x48] sm:$0xff] %v934_v62  ;;  %1030 = vst [vmem:[%s1754_s9 + $0x148] sm:$0xff] %v966_v63  ;;  %v557_v1 = vpop.f32.mrb[10].mxu0  ;;  %v653_v2 = vpop.f32.mrb[10].mxu1 }
 0x166   : > { %v935_v3 = vadd.f32 %v1746_v23, %v557_v1  ;;  %v967_v4 = vadd.f32 %v1746_v23, %v653_v2  ;;  %v559_v5 = vpop.f32.mrb[11].mxu0  ;;  %v655_v6 = vpop.f32.mrb[11].mxu1 }
 0x167   : > { %v936_v7 = vadd.f32 %v1748_v24, %v559_v5  ;;  %v968_v8 = vadd.f32 %v1748_v24, %v655_v6 }
 0x168   : > { %999 = vst [vmem:[%s1754_s9 + $0x50] sm:$0xff] %v935_v3  ;;  %1031 = vst [vmem:[%s1754_s9 + $0x150] sm:$0xff] %v967_v4 }
 0x169   : > { %1000 = vst [vmem:[%s1754_s9 + $0x58] sm:$0xff] %v936_v7  ;;  %1032 = vst [vmem:[%s1754_s9 + $0x158] sm:$0xff] %v968_v8  ;;  %v563_v9 = vpop.f32.mrb[12].mxu0  ;;  %v659_v10 = vpop.f32.mrb[12].mxu1 }
 0x16a   : > { %v937_v11 = vadd.f32 %v1746_v23, %v563_v9  ;;  %v969_v12 = vadd.f32 %v1746_v23, %v659_v10  ;;  %v565_v13 = vpop.f32.mrb[13].mxu0  ;;  %v661_v14 = vpop.f32.mrb[13].mxu1 }
 0x16b   : > { %v938_v15 = vadd.f32 %v1748_v24, %v565_v13  ;;  %v970_v16 = vadd.f32 %v1748_v24, %v661_v14 }
 0x16c   : > { %1001 = vst [vmem:[%s1754_s9 + $0x60] sm:$0xff] %v937_v11  ;;  %1033 = vst [vmem:[%s1754_s9 + $0x160] sm:$0xff] %v969_v12 }
 0x16d   : > { %1002 = vst [vmem:[%s1754_s9 + $0x68] sm:$0xff] %v938_v15  ;;  %1034 = vst [vmem:[%s1754_s9 + $0x168] sm:$0xff] %v970_v16  ;;  %v569_v17 = vpop.f32.mrb[14].mxu0  ;;  %v665_v18 = vpop.f32.mrb[14].mxu1 }
 0x16e   : > { %v939_v19 = vadd.f32 %v1746_v23, %v569_v17  ;;  %v971_v20 = vadd.f32 %v1746_v23, %v665_v18  ;;  %v571_v21 = vpop.f32.mrb[15].mxu0  ;;  %v667_v22 = vpop.f32.mrb[15].mxu1 }
 0x16f   : > { %v940_v25 = vadd.f32 %v1748_v24, %v571_v21  ;;  %v972_v26 = vadd.f32 %v1748_v24, %v667_v22 }
 0x170   : > { %1003 = vst [vmem:[%s1754_s9 + $0x70] sm:$0xff] %v939_v19  ;;  %1035 = vst [vmem:[%s1754_s9 + $0x170] sm:$0xff] %v971_v20 }
 0x171   : > { %1004 = vst [vmem:[%s1754_s9 + $0x78] sm:$0xff] %v940_v25  ;;  %1036 = vst [vmem:[%s1754_s9 + $0x178] sm:$0xff] %v972_v26  ;;  %v575_v0 = vpop.f32.mrb[16].mxu0  ;;  %v671_v27 = vpop.f32.mrb[16].mxu1 }
 0x172   : > { %v941_v28 = vadd.f32 %v1746_v23, %v575_v0  ;;  %v973_v29 = vadd.f32 %v1746_v23, %v671_v27  ;;  %v577_v30 = vpop.f32.mrb[17].mxu0  ;;  %v673_v31 = vpop.f32.mrb[17].mxu1 }
 0x173   : > { %v942_v32 = vadd.f32 %v1748_v24, %v577_v30  ;;  %v974_v33 = vadd.f32 %v1748_v24, %v673_v31 }
 0x174   : > { %1005 = vst [vmem:[%s1754_s9 + $0x80] sm:$0xff] %v941_v28  ;;  %1037 = vst [vmem:[%s1754_s9 + $0x180] sm:$0xff] %v973_v29 }
 0x175   : > { %1006 = vst [vmem:[%s1754_s9 + $0x88] sm:$0xff] %v942_v32  ;;  %1038 = vst [vmem:[%s1754_s9 + $0x188] sm:$0xff] %v974_v33  ;;  %v581_v34 = vpop.f32.mrb[18].mxu0  ;;  %v677_v35 = vpop.f32.mrb[18].mxu1 }
 0x176   : > { %v943_v36 = vadd.f32 %v1746_v23, %v581_v34  ;;  %v975_v37 = vadd.f32 %v1746_v23, %v677_v35  ;;  %v583_v38 = vpop.f32.mrb[19].mxu0  ;;  %v679_v39 = vpop.f32.mrb[19].mxu1 }
 0x177   : > { %v944_v40 = vadd.f32 %v1748_v24, %v583_v38  ;;  %v976_v41 = vadd.f32 %v1748_v24, %v679_v39 }
 0x178   : > { %1007 = vst [vmem:[%s1754_s9 + $0x90] sm:$0xff] %v943_v36  ;;  %1039 = vst [vmem:[%s1754_s9 + $0x190] sm:$0xff] %v975_v37 }
 0x179   : > { %1008 = vst [vmem:[%s1754_s9 + $0x98] sm:$0xff] %v944_v40  ;;  %1040 = vst [vmem:[%s1754_s9 + $0x198] sm:$0xff] %v976_v41  ;;  %v587_v42 = vpop.f32.mrb[20].mxu0  ;;  %v683_v43 = vpop.f32.mrb[20].mxu1 }
 0x17a   : > { %v945_v44 = vadd.f32 %v1746_v23, %v587_v42  ;;  %v977_v45 = vadd.f32 %v1746_v23, %v683_v43  ;;  %v589_v46 = vpop.f32.mrb[21].mxu0  ;;  %v685_v47 = vpop.f32.mrb[21].mxu1 }
 0x17b   : > { %v946_v48 = vadd.f32 %v1748_v24, %v589_v46  ;;  %v978_v49 = vadd.f32 %v1748_v24, %v685_v47 }
 0x17c   : > { %1009 = vst [vmem:[%s1754_s9 + $0xa0] sm:$0xff] %v945_v44  ;;  %1041 = vst [vmem:[%s1754_s9 + $0x1a0] sm:$0xff] %v977_v45 }
 0x17d   : > { %1010 = vst [vmem:[%s1754_s9 + $0xa8] sm:$0xff] %v946_v48  ;;  %1042 = vst [vmem:[%s1754_s9 + $0x1a8] sm:$0xff] %v978_v49  ;;  %v593_v50 = vpop.f32.mrb[22].mxu0  ;;  %v689_v51 = vpop.f32.mrb[22].mxu1 }
 0x17e   : > { %v947_v52 = vadd.f32 %v1746_v23, %v593_v50  ;;  %v979_v53 = vadd.f32 %v1746_v23, %v689_v51  ;;  %v595_v54 = vpop.f32.mrb[23].mxu0  ;;  %v691_v55 = vpop.f32.mrb[23].mxu1 }
 0x17f   : > { %v948_v56 = vadd.f32 %v1748_v24, %v595_v54  ;;  %v980_v57 = vadd.f32 %v1748_v24, %v691_v55 }
 0x180   : > { %1011 = vst [vmem:[%s1754_s9 + $0xb0] sm:$0xff] %v947_v52  ;;  %1043 = vst [vmem:[%s1754_s9 + $0x1b0] sm:$0xff] %v979_v53 }
 0x181   : > { %1012 = vst [vmem:[%s1754_s9 + $0xb8] sm:$0xff] %v948_v56  ;;  %1044 = vst [vmem:[%s1754_s9 + $0x1b8] sm:$0xff] %v980_v57  ;;  %v599_v58 = vpop.f32.mrb[24].mxu0  ;;  %v695_v59 = vpop.f32.mrb[24].mxu1 }
 0x182   : > { %v949_v60 = vadd.f32 %v1746_v23, %v599_v58  ;;  %v981_v61 = vadd.f32 %v1746_v23, %v695_v59  ;;  %v601_v62 = vpop.f32.mrb[25].mxu0  ;;  %v697_v63 = vpop.f32.mrb[25].mxu1 }
 0x183   : > { %v950_v1 = vadd.f32 %v1748_v24, %v601_v62  ;;  %v982_v2 = vadd.f32 %v1748_v24, %v697_v63 }
 0x184   : > { %1013 = vst [vmem:[%s1754_s9 + $0xc0] sm:$0xff] %v949_v60  ;;  %1045 = vst [vmem:[%s1754_s9 + $0x1c0] sm:$0xff] %v981_v61 }
 0x185   : > { %1014 = vst [vmem:[%s1754_s9 + $0xc8] sm:$0xff] %v950_v1  ;;  %1046 = vst [vmem:[%s1754_s9 + $0x1c8] sm:$0xff] %v982_v2  ;;  %v605_v3 = vpop.f32.mrb[26].mxu0  ;;  %v701_v4 = vpop.f32.mrb[26].mxu1 }
 0x186   : > { %v951_v5 = vadd.f32 %v1746_v23, %v605_v3  ;;  %v983_v6 = vadd.f32 %v1746_v23, %v701_v4  ;;  %v607_v7 = vpop.f32.mrb[27].mxu0  ;;  %v703_v8 = vpop.f32.mrb[27].mxu1 }
 0x187   : > { %v952_v9 = vadd.f32 %v1748_v24, %v607_v7  ;;  %v984_v10 = vadd.f32 %v1748_v24, %v703_v8 }
 0x188   : > { %1015 = vst [vmem:[%s1754_s9 + $0xd0] sm:$0xff] %v951_v5  ;;  %1047 = vst [vmem:[%s1754_s9 + $0x1d0] sm:$0xff] %v983_v6 }
 0x189   : > { %1016 = vst [vmem:[%s1754_s9 + $0xd8] sm:$0xff] %v952_v9  ;;  %1048 = vst [vmem:[%s1754_s9 + $0x1d8] sm:$0xff] %v984_v10  ;;  %v611_v11 = vpop.f32.mrb[28].mxu0  ;;  %v707_v12 = vpop.f32.mrb[28].mxu1 }
 0x18a   : > { %v953_v13 = vadd.f32 %v1746_v23, %v611_v11  ;;  %v985_v14 = vadd.f32 %v1746_v23, %v707_v12  ;;  %v613_v15 = vpop.f32.mrb[29].mxu0  ;;  %v709_v16 = vpop.f32.mrb[29].mxu1 }
 0x18b   : > { %v954_v17 = vadd.f32 %v1748_v24, %v613_v15  ;;  %v986_v18 = vadd.f32 %v1748_v24, %v709_v16 }
 0x18c   : > { %1017 = vst [vmem:[%s1754_s9 + $0xe0] sm:$0xff] %v953_v13  ;;  %1049 = vst [vmem:[%s1754_s9 + $0x1e0] sm:$0xff] %v985_v14 }
 0x18d   : > { %1018 = vst [vmem:[%s1754_s9 + $0xe8] sm:$0xff] %v954_v17  ;;  %1050 = vst [vmem:[%s1754_s9 + $0x1e8] sm:$0xff] %v986_v18  ;;  %v617_v19 = vpop.f32.mrb[30].mxu0  ;;  %v713_v20 = vpop.f32.mrb[30].mxu1 }
 0x18e   : > { %v955_v21 = vadd.f32 %v1746_v23, %v617_v19  ;;  %v987_v22 = vadd.f32 %v1746_v23, %v713_v20  ;;  %v619_v25 = vpop.f32.mrb[31].mxu0  ;;  %v715_v26 = vpop.f32.mrb[31].mxu1 }
 0x18f   : > { %v956_v0 = vadd.f32 %v1748_v24, %v619_v25  ;;  %v988_v27 = vadd.f32 %v1748_v24, %v715_v26 }
 0x190   : > { %1019 = vst [vmem:[%s1754_s9 + $0xf0] sm:$0xff] %v955_v21  ;;  %1051 = vst [vmem:[%s1754_s9 + $0x1f0] sm:$0xff] %v987_v22 }
 0x191   : > { %1020 = vst [vmem:[%s1754_s9 + $0xf8] sm:$0xff] %v956_v0  ;;  %1052 = vst [vmem:[%s1754_s9 + $0x1f8] sm:$0xff] %v988_v27 }
 0x192   : > { %1407 = shalt.err (!%p1404_p5)
}
 0x193   : > { %s1408_s29 = scalar_lea.hbm %s1879_s26, 8192  ;;  %s1412_s20 = scalar_lea.hbm %s1939_s3, 16384 }
 0x194   : > { %p1409_p9 = scmp.ne.s32.totalorder %s1879_s26, %s1408_s29  ;;  %p1413_p3 = scmp.lt.u32.totalorder %s1879_s26, %s1939_s3 }
 0x195   : > { %p1414_p7 = scmp.lt.u32.totalorder %s1412_s20, %s1408_s29  ;;  %p1416_p4 = scmp.lt.u32.totalorder %s1408_s29, %s1879_s26 }
 0x196   : > { %p1410_p1 = pnand %p1409_p9, %p1608_p10 }
 0x197   : > { %p1415_p13 = por %p1414_p7, %p1413_p3 }
 0x198   : > { %p1411_p2 = pneg %p1410_p1 }
 0x199   : > { %p1417_p6 = por %p1416_p4, %p1415_p13 }
 0x19b   : > { %p1418_p8 = pnand %p1417_p6, %p1411_p2 }
 0x19d   : > { %1421 = shalt.err (!%p1418_p8)
}
 0x19e   : > { %s1490_s9 = smov 256   ;;  %s1491_s10 = smov 16  }
 0x19f   : > { %1262 = dma.vmem_to_hbm [thread:$0]  (%p1608_p10), %s1881_s11, 8192, %s1879_s26, %s1054_s7, %s1490_s9, %s1490_s9, %s1491_s10  }
 0x1a0 PF: > { %s1085_s15 = sand.u32 1, %s1460_s12   ;;  %p1957_p12 = scmp.ne.s32.totalorder %s1947_s23, 0 }
 0x1a1   : > { %p1958_p11 = scmp.ge.s32.totalorder %s1480_s17, 2  ;;  %s1086_s18 = scalar_lea.sflag [#allocation5], %s1085_s15 }
 0x1a3   : > { %p1273_p0 = pnand %p1958_p11, %p1957_p12 }
 0x1a5   : > { %1455 = dma.done.wait (!%p1273_p0), %s1086_s18, 8192  }
 0x1a6   : > { %1457 = vsyncadd (!%p1273_p0), %s1086_s18, 4294959104  ;;  %s20_s17 = sadd.s32 1, %s1480_s17   ;;  %s1959_s12 = smov %s1464_s13 }
 0x1a7   : > { %p17_p5 = scmp.ge.s32.totalorder %s20_s17, 4   ;;  %s1960_s13 = smov %s1468_s14 }
 0x1a8   : > { %s1961_s14 = smov %s1617_s5  ;;  %s1962_s15 = smov %s1476_s16 }
 0x1a9   : > { %s1963_s16 = smov %s1965_s28  ;;  %19 = sbr.rel (!%p17_p5) target bundleno = 7 (0x7), region = 93 }
 0x1b0   :  { %1091 = vsyncpa [#allocation4], 1 }
 0x1b1   :  { %1093 = vsyncpa [#allocation4 + $0x1], 1 }
 0x1b2   :  { %1094 = vsyncpa [#allocation7], 1 }
 0x1b3   :  { %1095 = vsyncpa [#allocation5], 1 }
 0x1b4   :  { %1097 = vsyncpa [#allocation5 + $0x1], 1 }

</bundles_post_ra>
